<compile_context>
chip_gen: v7x
topology: tpu7x:2x2x1
jax: 0.10.0
libtpu: 0.0.40
codegen_flags: <defaults>
</compile_context>

<pallas_src>
import functools

import jax
import jax.numpy as jnp
from jax.experimental import pallas as pl
from jax.experimental.pallas import tpu as pltpu


def _softmax_kernel(x_ref, o_ref):
    """Numerically stable softmax over the last axis of one (block_rows, T) tile.

    The exp result goes straight into o_ref and is re-read for the row sum, so
    no tile-sized temporary stays live (smaller VMEM footprint per grid step).
    Rows are independent; garbage rows of a ragged final row-block are computed
    but discarded by the masked output store.
    """
    x = x_ref[...]
    row_max = jnp.max(x, axis=-1, keepdims=True)
    o_ref[...] = jnp.exp(x - row_max)                       # single exp pass (EUP)
    denom = jnp.sum(o_ref[...], axis=-1, keepdims=True)
    # Only (block_rows, 1) reciprocals; exact (non-approx) to stay well inside
    # the 1e-5 tolerance vs. the reference softmax.
    o_ref[...] = o_ref[...] * pl.reciprocal(denom, approx=False)


@functools.lru_cache(maxsize=None)
def _tpu_caps():
    """Returns (physical VMEM bytes, TensorCores-per-chip guess), conservative fallback."""
    vmem = 64 << 20   # safe floor: v7x has 64 MiB per TC
    cores = 1
    try:
        info = pltpu.get_tpu_info()
        vmem = int(getattr(info, "vmem_capacity_bytes", vmem)) or vmem
        for name in ("num_cores", "core_count", "num_tensorcores",
                     "tensorcores_per_chip", "cores_per_chip"):
            val = getattr(info, name, None)
            if isinstance(val, int) and val > 0:
                cores = val
                break
    except Exception:
        pass  # no TPU info available -> conservative defaults
    return vmem, cores


def _pick_block_rows(n0: int, t: int, target_tile_bytes: int, num_cores: int) -> int:
    row_bytes = 4 * t  # float32
    block_rows = max(8, (target_tile_bytes // max(row_bytes, 1)) // 8 * 8)
    if num_cores > 1:
        # Dual-TC chips (v7x): aim for >= 2 balanced steps per core so both
        # cores get work and cross-step DMA prefetch hides behind compute.
        min_steps = 2 * num_cores
        if n0 >= min_steps * 8:
            block_rows = min(block_rows, pl.cdiv(pl.cdiv(n0, min_steps), 8) * 8)
    # Single-TC chips (v5e/v6e): no step cap -- bigger tiles track the HBM
    # roofline better, extra steps are pure per-step overhead.
    if block_rows >= n0:
        return n0  # full-extent block: exempt from the 8-divisibility rule
    # Balance the grid: even out the ragged last block without changing the
    # number of steps.
    steps = pl.cdiv(n0, block_rows)
    return max(8, min(block_rows, pl.cdiv(pl.cdiv(n0, steps), 8) * 8))


def long_softmax(x: jax.Array, *, target_tile_bytes: int = 4 << 20) -> jax.Array:
    """Row-wise softmax of a float32 [N0, T] array, computed in a Pallas kernel."""
    assert x.ndim == 2 and x.dtype == jnp.float32
    n0, t = x.shape

    vmem_bytes, num_cores = _tpu_caps()
    # ~75% of physical VMEM: 48 MiB on v7x (64 MiB), ~96 MiB on v5e/v6e (128 MiB).
    vmem_limit = min(100 << 20, max(32 << 20, (vmem_bytes * 3) // 4))

    # TODO(synk): for truly huge T (a block_rows>=8 full-row block no longer
    # fits the VMEM limit; roughly T > ~800k f32 cols on v5e/v6e, ~half on v7x),
    # restructure as an online softmax with a trailing 'arbitrary' grid axis
    # over T plus scratch (max, sum) accumulators.
    block_rows = _pick_block_rows(n0, t, target_tile_bytes, num_cores)
    grid = (pl.cdiv(n0, block_rows),)

    return pl.pallas_call(
        _softmax_kernel,
        out_shape=jax.ShapeDtypeStruct((n0, t), jnp.float32),
        grid=grid,
        # Full softmax axis per block; do NOT pad T in the wrapper (extra HBM
        # round trip) -- lane masking of the last <128 group is cheaper.
        in_specs=[pl.BlockSpec((block_rows, t), lambda i: (i, 0))],
        out_specs=pl.BlockSpec((block_rows, t), lambda i: (i, 0)),
        compiler_params=pltpu.CompilerParams(
            # "parallel" shards the row grid across TensorCores on multi-core
            # chips and is a no-op on single-TC chips.
            dimension_semantics=("parallel",),
            vmem_limit_bytes=vmem_limit,
        ),
    )(x)


class Model:
    """JAX/Pallas equivalent of the PyTorch Model wrapping the Triton long softmax."""

    def __call__(self, x: jax.Array) -> jax.Array:
        return long_softmax(x)


if __name__ == "__main__":
    key = jax.random.PRNGKey(0)
    model = Model()

    # Case 1: small 2D float32 input; T=200 is not a multiple of 128
    # (exercises the masked-lane path); whole array fits one full-extent block.
    n0, t = 20, 200
    x = jax.random.normal(key, (n0, t), dtype=jnp.float32) * 3.0
    out = jax.block_until_ready(model(x))
    ref = jax.nn.softmax(x, axis=-1)
    assert out.shape == x.shape and out.dtype == jnp.float32
    max_err = float(jnp.max(jnp.abs(out - ref)))
    assert jnp.allclose(out, ref, atol=1e-5, rtol=1e-5), f"max abs err = {max_err}"

    # Case 2: force a multi-step row grid with a ragged final block (still small).
    k2 = jax.random.fold_in(key, 1)
    x2 = jax.random.normal(k2, (256, 384), dtype=jnp.float32) * 2.0
    out2 = jax.block_until_ready(long_softmax(x2, target_tile_bytes=64 << 10))
    ref2 = jax.nn.softmax(x2, axis=-1)
    max_err2 = float(jnp.max(jnp.abs(out2 - ref2)))
    assert jnp.allclose(out2, ref2, atol=1e-5, rtol=1e-5), f"max abs err = {max_err2}"

    print("KERNEL_OK")
</pallas_src>

<mosaic_0001>
module attributes {stable_mosaic.version = 11 : i64} {
  func.func @_softmax_kernel(%arg0: i32, %arg1: memref<20x200xf32, #tpu.memory_space<vmem>>, %arg2: memref<20x200xf32, #tpu.memory_space<vmem>>) attributes {dimension_semantics = [#tpu.dimension_semantics<parallel>], iteration_bounds = array<i64: 1>, scalar_prefetch = 0 : i64, scratch_operands = 0 : i64, tpu.core_type = #tpu.core_type<tc>, window_params = [{transform_indices = @transform_0, window_bounds = array<i64: 20, 200>}, {transform_indices = @transform_1, window_bounds = array<i64: 20, 200>}]} {
    %c0 = arith.constant 0 : index
    %c0_0 = arith.constant 0 : index
    %0 = vector.load %arg1[%c0, %c0_0] : memref<20x200xf32, #tpu.memory_space<vmem>>, vector<20x200xf32>
    %cst = arith.constant dense<0xFF800000> : vector<20xf32>
    %1 = vector.multi_reduction <maximumf>, %0, %cst [1] : vector<20x200xf32> to vector<20xf32>
    %2 = vector.shape_cast %1 : vector<20xf32> to vector<20x1xf32>
    %3 = vector.broadcast %2 : vector<20x1xf32> to vector<20x200xf32>
    %4 = arith.subf %0, %3 : vector<20x200xf32>
    %5 = math.exp %4 : vector<20x200xf32>
    %c0_1 = arith.constant 0 : index
    %c0_2 = arith.constant 0 : index
    %6 = vector.load %arg2[%c0_1, %c0_2] : memref<20x200xf32, #tpu.memory_space<vmem>>, vector<20x200xf32>
    tpu.vector_store %arg2[%c0_1, %c0_2], %5 {strides = array<i32>} : memref<20x200xf32, #tpu.memory_space<vmem>>, vector<20x200xf32>,
    %c0_3 = arith.constant 0 : index
    %c0_4 = arith.constant 0 : index
    %7 = vector.load %arg2[%c0_3, %c0_4] : memref<20x200xf32, #tpu.memory_space<vmem>>, vector<20x200xf32>
    %cst_5 = arith.constant dense<0.000000e+00> : vector<20xf32>
    %8 = vector.multi_reduction <add>, %7, %cst_5 [1] : vector<20x200xf32> to vector<20xf32>
    %9 = vector.shape_cast %8 : vector<20xf32> to vector<20x1xf32>
    %c0_6 = arith.constant 0 : index
    %c0_7 = arith.constant 0 : index
    %10 = vector.load %arg2[%c0_6, %c0_7] : memref<20x200xf32, #tpu.memory_space<vmem>>, vector<20x200xf32>
    %11 = tpu.reciprocal %9 : vector<20x1xf32> -> vector<20x1xf32>
    %12 = vector.broadcast %11 : vector<20x1xf32> to vector<20x200xf32>
    %13 = arith.mulf %10, %12 : vector<20x200xf32>
    %c0_8 = arith.constant 0 : index
    %c0_9 = arith.constant 0 : index
    %14 = vector.load %arg2[%c0_8, %c0_9] : memref<20x200xf32, #tpu.memory_space<vmem>>, vector<20x200xf32>
    tpu.vector_store %arg2[%c0_8, %c0_9], %13 {strides = array<i32>} : memref<20x200xf32, #tpu.memory_space<vmem>>, vector<20x200xf32>,
    return
  }
  func.func @transform_0(%arg0: i32) -> (i32, i32) {
    %c0_i32 = arith.constant 0 : i32
    %c0_i32_0 = arith.constant 0 : i32
    return %arg0, %c0_i32 : i32, i32
  }
  func.func @transform_1(%arg0: i32) -> (i32, i32) {
    %c0_i32 = arith.constant 0 : i32
    %c0_i32_0 = arith.constant 0 : i32
    return %arg0, %c0_i32 : i32, i32
  }
}

</mosaic_0001>

<bundles_post_ra>
// kernel: tpu_custom_call.1
= control target key start
LH: loop header
LB: loop body
LE: loop exit
PB: predicated region body
PF: predicated region fallthrough
CT: control target
= control target key end

     0   :  { %6 = vsyncpa [#allocation3], 0  ;;  %s248_s0 = inlined_call_operand.hbm [shape: f32[20,200], index: 0, kind: input, shape index: {}]   ;;  %s249_s1 = inlined_call_operand.hbm [shape: f32[20,200], index: 1, kind: output, shape index: {}]  }
   0x1   :  { %7 = vsyncpa [#allocation4], 0  ;;  %s190_s6 = smov [#allocation2]   ;;  %s142_s10 = scalar_lea.hbm %s248_s0, 768 }
   0x2   :  { %s13_s7 = sshll.u32 %s190_s6, 4  ;;  %p143_p0 = scmp.ne.s32.totalorder %s248_s0, %s142_s10  ;;  %s14_s7 = int_to_ptr.vmem [resolvable:$true] %s13_s7 }
   0x3   :  { %p146_p1 = scmp.lt.u32.totalorder %s142_s10, %s248_s0 }
   0x5   :  { %p148_p2 = pnand %p146_p1, %p143_p0 }
   0x7   :  { %151 = shalt.err (!%p148_p2)
}
   0x8   :  { %s152_s15 = scalar_lea.vmem %s14_s7, 768  ;;  %p157_p4 = scmp.lt.s32.totalorder %s14_s7, %s14_s7 }
   0x9   :  { %p153_p3 = scmp.ne.s32.totalorder %s14_s7, %s152_s15  ;;  %p158_p5 = scmp.lt.s32.totalorder %s152_s15, %s152_s15 }
   0xb   :  { %p159_p6 = por %p158_p5, %p157_p4 }
   0xd   :  { %p160_p7 = pnand %p159_p6, %p153_p3 }
   0xf   :  { %163 = shalt.err (!%p160_p7)
}
  0x10   :  { %s191_s16 = smov 256   ;;  %s192_s17 = smov 16  }
  0x11   :  { %19 = dma.hbm_to_vmem [thread:$0]  %s248_s0, 768, %s14_s7, [#allocation3], %s191_s16, %s191_s16, %s192_s17  }
  0x12   :  { %186 = dma.done.wait [#allocation3], 768  }
  0x13   :  { %187 = vsyncadd [#allocation3], 4294966528  ;;  %vm29_vm0 = vcmask 588800   ;;  %vm38_vm1 = vcmask 1043456   ;;  %vm40_vm2 = vcmask 584704   ;;  %v23_v0 = vld [vmem:[#allocation2] sm:$0xff] }
  0x14   :  { %v24_v1 = vld [vmem:[#allocation2 + $0x8] sm:$0xff]  ;;  %v27_v2 = vld [vmem:[#allocation2 + $0x20] sm:$0xf]  ;;  %v25_v6 = vld [vmem:[#allocation2 + $0x10] sm:$0xff]  ;;  %s193_s0 = smov [#allocation5]  }
  0x15   :  { %v30_v3 = vsel %vm29_vm0, %v24_v1, -inf  ;;  %v28_v4 = vld [vmem:[#allocation2 + $0x28] sm:$0xf]  ;;  %v39_v5 = vsel %vm38_vm1, %v27_v2, -inf  ;;  %v26_v7 = vld [vmem:[#allocation2 + $0x18] sm:$0xff]  ;;  %s108_s20 = sshll.u32 %s193_s0, 4  ;;  %s109_s20 = int_to_ptr.vmem [resolvable:$true] %s108_s20 }
  0x16   :  { %v31_v8 = vmax.f32 %v23_v0, %v30_v3  ;;  %v41_v9 = vsel %vm40_vm2, %v28_v4, -inf  ;;  %v34_v10 = vsel %vm29_vm0, %v26_v7, -inf  ;;  %s164_s21 = scalar_lea.vmem %s109_s20, 768  ;;  %p169_p9 = scmp.lt.s32.totalorder %s109_s20, %s109_s20 }
  0x17   :  { %v42_v11 = vmax.f32 %v39_v5, %v41_v9  ;;  %v35_v12 = vmax.f32 %v25_v6, %v34_v10  ;;  %p165_p8 = scmp.ne.s32.totalorder %s109_s20, %s164_s21  ;;  %p170_p10 = scmp.lt.s32.totalorder %s164_s21, %s164_s21 }
  0x18   :  { %32 = vmax.xlane.f32.xlu0 %v31_v8 }
  0x19   :  { %43 = vmax.xlane.f32.xlu1 %v42_v11  ;;  %p171_p11 = por %p170_p10, %p169_p9 }
  0x1b   :  { %p172_p12 = pnand %p171_p11, %p165_p8 }
  0x1c   :  { %36 = vmax.xlane.f32.xlu0 %v35_v12 }
  0xa5   :  { %v33_v13 = vpop.xlane.xlu0 %32 }
  0xa6   :  { %v46_v14 = vsub.f32 %v24_v1, %v33_v13  ;;  %v44_v15 = vpop.xlane.xlu1 %43  ;;  %v45_v23 = vsub.f32 %v23_v0, %v33_v13 }
  0xa7   :  { %v49_v16 = vsub.f32 %v27_v2, %v44_v15  ;;  %v50_v17 = vsub.f32 %v28_v4, %v44_v15 }
  0xa8   :  { %v53_v18 = vmul.f32 1.442695, %v46_v14  ;;  %v51_v25 = vmul.f32 1.442695, %v45_v23 }
  0xa9   :  { %v59_v19 = vmul.f32 1.442695, %v49_v16  ;;  %v61_v20 = vmul.f32 1.442695, %v50_v17  ;;  %v37_v21 = vpop.xlane.xlu0 %36 }
  0xaa   :  { %v48_v22 = vsub.f32 %v26_v7, %v37_v21  ;;  %124 = vpow2.f32 %v53_v18  ;;  %v47_v26 = vsub.f32 %v25_v6, %v37_v21 }
  0xab   :  { %126 = vpow2.f32 %v59_v19 }
  0xac   :  { %v57_v24 = vmul.f32 1.442695, %v48_v22  ;;  %128 = vpow2.f32 %v61_v20  ;;  %v55_v27 = vmul.f32 1.442695, %v47_v26 }
  0xae   :  { %130 = vpow2.f32 %v57_v24 }
  0xaf   :  { %132 = vpow2.f32 %v51_v25 }
  0xb0   :  { %134 = vpow2.f32 %v55_v27 }
  0xb4   :  { %v125_v28 = vpop.eup %124 }
  0xb5   :  { %v127_v29 = vpop.eup %126  ;;  %64 = vst.msk [vmem:[#allocation5 + $0x8] sm:$0xff] %vm29_vm0, %v125_v28 }
  0xb6   :  { %v129_v30 = vpop.eup %128  ;;  %67 = vst [vmem:[#allocation5 + $0x20] sm:$0xf] %v127_v29 }
  0xb7   :  { %68 = vst.msk [vmem:[#allocation5 + $0x28] sm:$0xf] %vm40_vm2, %v129_v30 }
  0xb8   :  { %v131_v31 = vpop.eup %130 }
  0xb9   :  { %66 = vst.msk [vmem:[#allocation5 + $0x18] sm:$0xff] %vm29_vm0, %v131_v31  ;;  %v133_v33 = vpop.eup %132 }
  0xba   :  { %v135_v42 = vpop.eup %134 }
  0xbc   :  { %v70_v32 = vld [vmem:[#allocation5 + $0x8] sm:$0xff] }
  0xbd   :  { %v75_v34 = vsel %vm29_vm0, %v70_v32, 0.0  ;;  %v73_v35 = vld [vmem:[#allocation5 + $0x20] sm:$0xf] }
  0xbe   :  { %v76_v36 = vadd.f32 %v133_v33, %v75_v34  ;;  %v74_v37 = vld [vmem:[#allocation5 + $0x28] sm:$0xf]  ;;  %v83_v38 = vsel %vm38_vm1, %v73_v35, 0.0 }
  0xbf   :  { %v84_v39 = vsel %vm40_vm2, %v74_v37, 0.0 }
  0xc0   :  { %77 = vadd.xlane.f32.xlu1 %v76_v36  ;;  %v85_v40 = vadd.f32 %v84_v39, %v83_v38  ;;  %v72_v41 = vld [vmem:[#allocation5 + $0x18] sm:$0xff] }
  0xc1   :  { %v79_v43 = vsel %vm29_vm0, %v72_v41, 0.0 }
  0xc2   :  { %v80_v44 = vadd.f32 %v135_v42, %v79_v43 }
  0xc4   :  { %86 = vadd.xlane.f32.xlu1 %v85_v40  ;;  %81 = vadd.xlane.f32.xlu0 %v80_v44 }
 0x14d   :  { %v78_v45 = vpop.xlane.xlu1 %77 }
 0x14e   :  { %136 = vrcp.f32 %v78_v45 }
 0x151   :  { %v87_v46 = vpop.xlane.xlu1 %86  ;;  %v82_v47 = vpop.xlane.xlu0 %81 }
 0x152   :  { %138 = vrcp.f32 %v87_v46 }
 0x153   :  { %140 = vrcp.f32 %v82_v47 }
 0x158   :  { %v137_v48 = vpop.eup %136 }
 0x159   :  { %v91_v49 = vmul.f32 %v137_v48, %v133_v33  ;;  %v92_v50 = vmul.f32 %v137_v48, %v70_v32 }
 0x15b   :  { %97 = vst [vmem:[#allocation5] sm:$0xff] %v91_v49  ;;  %98 = vst.msk [vmem:[#allocation5 + $0x8] sm:$0xff] %vm29_vm0, %v92_v50 }
 0x15c   :  { %v139_v51 = vpop.eup %138 }
 0x15d   :  { %v141_v52 = vpop.eup %140  ;;  %v95_v53 = vmul.f32 %v139_v51, %v73_v35  ;;  %v96_v54 = vmul.f32 %v139_v51, %v74_v37 }
 0x15e   :  { %v93_v55 = vmul.f32 %v141_v52, %v135_v42  ;;  %v94_v56 = vmul.f32 %v141_v52, %v72_v41 }
 0x15f   :  { %101 = vst [vmem:[#allocation5 + $0x20] sm:$0xf] %v95_v53  ;;  %102 = vst.msk [vmem:[#allocation5 + $0x28] sm:$0xf] %vm40_vm2, %v96_v54 }
 0x160   :  { %99 = vst [vmem:[#allocation5 + $0x10] sm:$0xff] %v93_v55  ;;  %100 = vst.msk [vmem:[#allocation5 + $0x18] sm:$0xff] %vm29_vm0, %v94_v56 }
 0x161   :  { %175 = shalt.err (!%p172_p12)
}
 0x162   :  { %s176_s24 = scalar_lea.hbm %s249_s1, 768 }
 0x163   :  { %p177_p13 = scmp.ne.s32.totalorder %s249_s1, %s176_s24  ;;  %p180_p0 = scmp.lt.u32.totalorder %s176_s24, %s249_s1 }
 0x165   :  { %p182_p1 = pnand %p180_p0, %p177_p13 }
 0x167   :  { %185 = shalt.err (!%p182_p1)
}
 0x168   :  { %114 = dma.vmem_to_hbm [thread:$0]  %s109_s20, 768, %s249_s1, [#allocation4], %s191_s16, %s191_s16, %s192_s17  }
 0x169   :  { %188 = dma.done.wait [#allocation4], 768  }
 0x16a   :  { %189 = vsyncadd [#allocation4], 4294966528 }
 0x16b   :  { %118 = vsyncpa [#allocation3], 1 }
 0x16c   :  { %119 = vsyncpa [#allocation4], 1 }

</bundles_post_ra>
